<compile_context>
chip_gen: v7x
topology: tpu7x:2x2x1
jax: 0.10.0
libtpu: 0.0.40
codegen_flags: <defaults>
</compile_context>

<pallas_src>
import jax
import jax.numpy as jnp
from jax.experimental import pallas as pl
from jax.experimental.pallas import tpu as pltpu

LANES = 128
DEFAULT_BLOCK_ROWS_F32 = 8192   # (8192, 128) f32 block == 4 MiB per input per step
CHUNK_ROWS = 256                # in-block chunk: (256, 128) stays in vregs


def _make_rmse_sum_kernel(rows: int, block_rows: int, chunk_rows: int):
    """Kernel computing sum((pred - true)^2) over a (rows, 128) slab.

    Emits an (8, 128) f32 partial-sum block (the output doubles as the
    cross-grid-step accumulator); final cross-lane reduce + sqrt are done in
    the wrapper.
    """
    steps = (rows + block_rows - 1) // block_rows
    last_rows = rows - (steps - 1) * block_rows          # in (0, block_rows]

    def kernel(pred_ref, true_ref, out_ref):
        i = pl.program_id(0)

        @pl.when(i == 0)
        def _():
            out_ref[...] = jnp.zeros_like(out_ref)

        def sq_fold(start, nrows):
            # (nrows, 128) native-dtype loads -> f32 diff^2 -> fold to (8, 128)
            # with pure VPU adds (the cross-lane reduce is deferred to wrapper).
            a = pred_ref[pl.ds(start, nrows), :].astype(jnp.float32)
            b = true_ref[pl.ds(start, nrows), :].astype(jnp.float32)
            d = a - b
            return (d * d).reshape(nrows // 8, 8, LANES).sum(axis=0)

        def process(valid_rows):
            # Reduce rows [0, valid_rows) of the current block in chunks so the
            # diff/square temporaries never spill to VMEM as multi-MiB slabs.
            acc = out_ref[...]
            n_chunks = valid_rows // chunk_rows
            rem = valid_rows - n_chunks * chunk_rows
            if n_chunks > 0:
                def body(c, a):
                    start = pl.multiple_of(c * chunk_rows, chunk_rows)
                    return a + sq_fold(start, chunk_rows)
                acc = jax.lax.fori_loop(0, n_chunks, body, acc,
                                        unroll=min(4, n_chunks))
            if rem > 0:
                acc = acc + sq_fold(n_chunks * chunk_rows, rem)
            out_ref[...] = acc

        if last_rows == block_rows:
            # Every grid block is full: single unmasked path.
            process(block_rows)
        else:
            last = pl.num_programs(0) - 1

            @pl.when(i < last)
            def _():
                process(block_rows)

            @pl.when(i == last)
            def _():
                # Partial last block: only the statically-known valid rows are
                # ever read, so no element masking is needed anywhere.
                process(last_rows)

    return kernel, steps


def _pallas_sq_sum(pred2d: jax.Array, true2d: jax.Array, block_rows: int) -> jax.Array:
    rows = pred2d.shape[0]
    kernel, steps = _make_rmse_sum_kernel(rows, block_rows,
                                          min(CHUNK_ROWS, block_rows))

    bytes_accessed = (pred2d.size * jnp.dtype(pred2d.dtype).itemsize
                      + true2d.size * jnp.dtype(true2d.dtype).itemsize
                      + 8 * LANES * 4)
    partial = pl.pallas_call(
        kernel,
        out_shape=jax.ShapeDtypeStruct((8, LANES), jnp.float32),
        grid_spec=pltpu.PrefetchScalarGridSpec(
            num_scalar_prefetch=0,
            grid=(steps,),
            in_specs=[
                pl.BlockSpec((block_rows, LANES), lambda i: (i, 0)),
                pl.BlockSpec((block_rows, LANES), lambda i: (i, 0)),
            ],
            out_specs=pl.BlockSpec((8, LANES), lambda i: (0, 0)),
        ),
        compiler_params=pltpu.CompilerParams(
            dimension_semantics=("arbitrary",),     # sequential reduction axis
            vmem_limit_bytes=32 * 1024 * 1024,      # fits all gens (v7x phys = 64 MiB)
        ),
        cost_estimate=pl.CostEstimate(
            flops=3 * pred2d.size, transcendentals=0, bytes_accessed=bytes_accessed),
    )(pred2d, true2d)
    return jnp.sum(partial)     # single tiny cross-lane reduce in the wrapper


def rmse_loss(y_pred: jax.Array, y_true: jax.Array) -> jax.Array:
    """sqrt(mean((y_pred - y_true)**2)) -- matches torch RMSELoss.forward."""
    assert y_pred.shape == y_true.shape, "shapes must match (no broadcasting here)"
    n = y_pred.size

    pred_flat = y_pred.reshape(-1)   # free (contiguous) reshape
    true_flat = y_true.reshape(-1)

    # Sublane alignment for the narrower dtype (8 rows f32, 16 bf16, 32 int8).
    itemsize = min(jnp.dtype(y_pred.dtype).itemsize, jnp.dtype(y_true.dtype).itemsize)
    scale = max(1, 4 // itemsize)
    sublanes = 8 * scale
    align = sublanes * LANES

    # Aligned prefix goes through the kernel as a zero-copy (rows, 128) view;
    # the < `align`-element tail is folded in with plain JAX (no pad copy).
    n_main = (n // align) * align
    tail_count = n - n_main

    if tail_count > 0:
        dt = (pred_flat[n_main:].astype(jnp.float32)
              - true_flat[n_main:].astype(jnp.float32))
        tail_sum = jnp.sum(dt * dt)
    else:
        tail_sum = jnp.float32(0.0)

    if n_main > 0:
        rows = n_main // LANES
        # ~4 MiB of HBM per input per step regardless of dtype.
        block_rows = min(DEFAULT_BLOCK_ROWS_F32 * scale, rows)
        main_sum = _pallas_sq_sum(pred_flat[:n_main].reshape(rows, LANES),
                                  true_flat[:n_main].reshape(rows, LANES),
                                  block_rows)
    else:
        main_sum = jnp.float32(0.0)

    return jnp.sqrt((main_sum + tail_sum) / n)


if __name__ == "__main__":
    key = jax.random.PRNGKey(0)
    k1, k2 = jax.random.split(key)
    # Small NCHW-like tensors (the loss itself is shape-agnostic).
    shape = (2, 4, 16, 16)
    y_pred = jax.random.normal(k1, shape, dtype=jnp.float32)
    y_true = jax.random.normal(k2, shape, dtype=jnp.float32)

    loss = jax.jit(rmse_loss)(y_pred, y_true)
    jax.block_until_ready(loss)

    # Sanity check against plain JAX reference.
    ref = jnp.sqrt(jnp.mean((y_pred - y_true) ** 2))
    assert jnp.allclose(loss, ref, rtol=1e-5, atol=1e-6), (loss, ref)

    print("KERNEL_OK")
</pallas_src>

<mosaic_0001>
module attributes {stable_mosaic.version = 11 : i64} {
  func.func @kernel(%arg0: i32, %arg1: memref<16x128xf32, #tpu.memory_space<vmem>>, %arg2: memref<16x128xf32, #tpu.memory_space<vmem>>, %arg3: memref<8x128xf32, #tpu.memory_space<vmem>>) attributes {dimension_semantics = [#tpu.dimension_semantics<arbitrary>], iteration_bounds = array<i64: 1>, scalar_prefetch = 0 : i64, scratch_operands = 0 : i64, tpu.core_type = #tpu.core_type<tc>, window_params = [{transform_indices = @transform_0, window_bounds = array<i64: 16, 128>}, {transform_indices = @transform_1, window_bounds = array<i64: 16, 128>}, {pipeline_mode = #tpu.pipeline_mode<synchronous>, transform_indices = @transform_2, window_bounds = array<i64: 8, 128>}]} {
    %c0_i32 = arith.constant 0 : i32
    %0 = arith.cmpi eq, %arg0, %c0_i32 : i32
    %1 = arith.extui %0 : i1 to i32
    %c0_i32_0 = arith.constant 0 : i32
    %2 = arith.cmpi ne, %1, %c0_i32_0 : i32
    scf.if %2 {
      %cst_7 = arith.constant 0.000000e+00 : f32
      %16 = vector.broadcast %cst_7 : f32 to vector<8x128xf32>
      %c0_8 = arith.constant 0 : index
      %c0_9 = arith.constant 0 : index
      %17 = vector.load %arg3[%c0_8, %c0_9] : memref<8x128xf32, #tpu.memory_space<vmem>>, vector<8x128xf32>
      tpu.vector_store %arg3[%c0_8, %c0_9], %16 {strides = array<i32>} : memref<8x128xf32, #tpu.memory_space<vmem>>, vector<8x128xf32>,
    } else {
    }
    %c0 = arith.constant 0 : index
    %c0_1 = arith.constant 0 : index
    %3 = vector.load %arg3[%c0, %c0_1] : memref<8x128xf32, #tpu.memory_space<vmem>>, vector<8x128xf32>
    %c0_i32_2 = arith.constant 0 : i32
    %c16_i32 = arith.constant 16 : i32
    %4 = arith.muli %c0_i32_2, %c16_i32 : i32
    %5 = tpu.assume_multiple %4, 16 : i32
    %6 = arith.index_cast %5 : i32 to index
    %c0_3 = arith.constant 0 : index
    %7 = vector.load %arg1[%6, %c0_3] : memref<16x128xf32, #tpu.memory_space<vmem>>, vector<16x128xf32>
    %8 = arith.index_cast %5 : i32 to index
    %c0_4 = arith.constant 0 : index
    %9 = vector.load %arg2[%8, %c0_4] : memref<16x128xf32, #tpu.memory_space<vmem>>, vector<16x128xf32>
    %10 = arith.subf %7, %9 : vector<16x128xf32>
    %11 = arith.mulf %10, %10 : vector<16x128xf32>
    %12 = vector.shape_cast %11 : vector<16x128xf32> to vector<2x8x128xf32>
    %cst = arith.constant dense<0.000000e+00> : vector<8x128xf32>
    %13 = vector.multi_reduction <add>, %12, %cst [0] : vector<2x8x128xf32> to vector<8x128xf32>
    %14 = arith.addf %3, %13 : vector<8x128xf32>
    %c1_i32 = arith.constant 1 : i32
    %c0_5 = arith.constant 0 : index
    %c0_6 = arith.constant 0 : index
    %15 = vector.load %arg3[%c0_5, %c0_6] : memref<8x128xf32, #tpu.memory_space<vmem>>, vector<8x128xf32>
    tpu.vector_store %arg3[%c0_5, %c0_6], %14 {strides = array<i32>} : memref<8x128xf32, #tpu.memory_space<vmem>>, vector<8x128xf32>,
    return
  }
  func.func @transform_0(%arg0: i32) -> (i32, i32) {
    %c0_i32 = arith.constant 0 : i32
    %c0_i32_0 = arith.constant 0 : i32
    return %arg0, %c0_i32 : i32, i32
  }
  func.func @transform_1(%arg0: i32) -> (i32, i32) {
    %c0_i32 = arith.constant 0 : i32
    %c0_i32_0 = arith.constant 0 : i32
    return %arg0, %c0_i32 : i32, i32
  }
  func.func @transform_2(%arg0: i32) -> (i32, i32) {
    %c0_i32 = arith.constant 0 : i32
    %c0_i32_0 = arith.constant 0 : i32
    %c0_i32_1 = arith.constant 0 : i32
    return %c0_i32, %c0_i32_0 : i32, i32
  }
}

</mosaic_0001>

<bundles_post_ra>
// kernel: rmse_loss.1
= control target key start
LH: loop header
LB: loop body
LE: loop exit
PB: predicated region body
PF: predicated region fallthrough
CT: control target
= control target key end

     0   :  { %s63_s0 = inlined_call_operand.vmem [shape: f32[16,128], index: 0, kind: input, shape index: {}]   ;;  %s64_s1 = inlined_call_operand.vmem [shape: f32[16,128], index: 1, kind: input, shape index: {}]   ;;  %s65_s2 = inlined_call_operand.vmem [shape: f32[8,128], index: 2, kind: output, shape index: {}]  }
   0x1   :  { %v17_v0 = vld [vmem:[%s63_s0] sm:$0xff]  ;;  %v18_v1 = vld [vmem:[%s63_s0 + $0x8] sm:$0xff] }
   0x2   :  { %v19_v2 = vld [vmem:[%s64_s1] sm:$0xff]  ;;  %v20_v3 = vld [vmem:[%s64_s1 + $0x8] sm:$0xff] }
   0x3   :  { %v21_v4 = vsub.f32 %v17_v0, %v19_v2  ;;  %v22_v5 = vsub.f32 %v18_v1, %v20_v3 }
   0x5   :  { %v23_v6 = vmul.f32 %v21_v4, %v21_v4  ;;  %v24_v7 = vmul.f32 %v22_v5, %v22_v5 }
   0x7   :  { %v25_v8 = vadd.f32 %v24_v7, %v23_v6 }
   0x9   :  { %27 = vst [vmem:[%s65_s2] sm:$0xff] %v25_v8 }

</bundles_post_ra>
